<compile_context>
chip_gen: v6e
topology: v6e:2x2x1
jax: 0.10.0
libtpu: 0.0.40
codegen_flags: <defaults>
</compile_context>

<pallas_src>
import jax
import jax.numpy as jnp
from jax.experimental import pallas as pl
from jax.experimental.pallas import tpu as pltpu

ACTION_SIZE = 5
NUM_AGENT_IDS = 5
NUM_ID_PAD = 8          # one-hot / embedding rows padded to 8 (sublane aligned)
EMB_DIM = 256
LN_EPS = 1e-5           # PyTorch nn.LayerNorm default
K_IN = 60               # timeseries * movement
K_IN_PAD = 64           # fc1 contraction dim after zero-padding 60 -> 64
N_OUT_PAD = 128         # lane-dense padded logits width
B_ALIGN = 16            # bf16-friendly batch-block alignment


def _round_up(v, m):
    return ((v + m - 1) // m) * m


def _pick_block(batch):
    """Batch block size: single block for tiny batches; otherwise ~8 grid steps
    clamped to [256, 2048], and always >= 2 steps when batch > 256 (v7x)."""
    if batch <= 256:
        return _round_up(max(batch, B_ALIGN), B_ALIGN)
    blk = _round_up(pl.cdiv(batch, 8), B_ALIGN)
    blk = max(256, min(2048, blk))
    if pl.cdiv(batch, blk) < 2:
        blk = _round_up(pl.cdiv(batch, 2), B_ALIGN)
    return blk


def _layernorm(h, gamma, beta):
    # One-pass mean / E[x^2]; biased variance; eps inside rsqrt (PyTorch LN). f32.
    mean = jnp.mean(h, axis=-1, keepdims=True)
    msq = jnp.mean(h * h, axis=-1, keepdims=True)
    var = msq - mean * mean
    inv = jax.lax.rsqrt(var + LN_EPS)
    return (h - mean) * inv * gamma + beta


def actor_kernel(x_ref, id_ref, w1_ref, emb_ref, p1_ref, w2_ref, p2_ref,
                 w3_ref, p3_ref, w4_ref, b4_ref, out_ref):
    x = x_ref[...]                                   # (b_blk, 64) bf16
    ids = id_ref[...]                                # (b_blk, 1) int32
    b_blk = x.shape[0]

    # One-hot agent id built in-kernel (VPU compare); embedding lookup is a tiny
    # K=8 bf16 MXU matmul fused into fc1's f32 accumulator.
    onehot = (jax.lax.broadcasted_iota(jnp.int32, (b_blk, NUM_ID_PAD), 1)
              == ids).astype(jnp.bfloat16)

    # fc1 + embedding + bias, then LN + ReLU (LN math in f32).
    h = jnp.dot(x, w1_ref[...], preferred_element_type=jnp.float32)
    h = h + jnp.dot(onehot, emb_ref[...], preferred_element_type=jnp.float32)
    h = h + p1_ref[0:1, :]
    h = _layernorm(h, p1_ref[1:2, :], p1_ref[2:3, :])
    h = jnp.maximum(h, 0.0)

    # fc2 + LN + ReLU
    h = jnp.dot(h.astype(jnp.bfloat16), w2_ref[...],
                preferred_element_type=jnp.float32)
    h = h + p2_ref[0:1, :]
    h = _layernorm(h, p2_ref[1:2, :], p2_ref[2:3, :])
    h = jnp.maximum(h, 0.0)

    # fc3 + LN + ReLU (kept at 64 lanes: LN reduction is over exactly 64 feats)
    h = jnp.dot(h.astype(jnp.bfloat16), w3_ref[...],
                preferred_element_type=jnp.float32)
    h = h + p3_ref[0:1, :]
    h = _layernorm(h, p3_ref[1:2, :], p3_ref[2:3, :])
    h = jnp.maximum(h, 0.0)

    # fc4 logits (lane-padded to 128; wrapper slices :action_size), bf16 out.
    h = jnp.dot(h.astype(jnp.bfloat16), w4_ref[...],
                preferred_element_type=jnp.float32) + b4_ref[...]
    out_ref[...] = h.astype(out_ref.dtype)


def init_params(key, action_size=ACTION_SIZE):
    ks = jax.random.split(key, 5)

    def lin(k, fan_in, fan_out):
        bound = 1.0 / jnp.sqrt(jnp.float32(fan_in))
        kw, kb = jax.random.split(k)
        w = jax.random.uniform(kw, (fan_in, fan_out), jnp.float32, -bound, bound)
        b = jax.random.uniform(kb, (1, fan_out), jnp.float32, -bound, bound)
        return w, b

    emb = jax.random.normal(ks[0], (NUM_AGENT_IDS, EMB_DIM), jnp.float32)
    w1, b1 = lin(ks[1], K_IN, 256)
    w2, b2 = lin(ks[2], 256, 128)
    w3, b3 = lin(ks[3], 128, 64)
    w4, b4 = lin(ks[4], 64, action_size)
    g1, be1 = jnp.ones((1, 256), jnp.float32), jnp.zeros((1, 256), jnp.float32)
    g2, be2 = jnp.ones((1, 128), jnp.float32), jnp.zeros((1, 128), jnp.float32)
    g3, be3 = jnp.ones((1, 64), jnp.float32), jnp.zeros((1, 64), jnp.float32)
    return dict(emb=emb, w1=w1, b1=b1, g1=g1, be1=be1,
                w2=w2, b2=b2, g2=g2, be2=be2,
                w3=w3, b3=b3, g3=g3, be3=be3,
                w4=w4, b4=b4)


def _pack_params(params, action_size):
    """Pack raw (PyTorch-layout) f32 params into bf16 kernel weights + f32 LN params."""
    bf = jnp.bfloat16
    # fc1 weight zero-padded 60 -> 64 contraction rows.
    w1p = jnp.zeros((K_IN_PAD, 256), bf).at[:K_IN, :].set(params['w1'].astype(bf))
    # Embedding table padded 5 -> 8 rows (rows 5..7 never selected).
    embp = jnp.zeros((NUM_ID_PAD, EMB_DIM), bf).at[:NUM_AGENT_IDS, :].set(
        params['emb'].astype(bf))
    # Per-layer (bias, gamma, beta) packed as f32 (3, width).
    p1 = jnp.concatenate([params['b1'], params['g1'], params['be1']], axis=0)
    p2 = jnp.concatenate([params['b2'], params['g2'], params['be2']], axis=0)
    p3 = jnp.concatenate([params['b3'], params['g3'], params['be3']], axis=0)
    w2 = params['w2'].astype(bf)
    w3 = params['w3'].astype(bf)
    # Lane-dense logits layer: pad output width to 128.
    w4p = jnp.zeros((64, N_OUT_PAD), bf).at[:, :action_size].set(
        params['w4'].astype(bf))
    b4p = jnp.zeros((1, N_OUT_PAD), jnp.float32).at[:, :action_size].set(params['b4'])
    return w1p, embp, p1, w2, p2, w3, p3, w4p, b4p


def actor_network_forward(x1, x2, params, action_size=ACTION_SIZE):
    assert action_size <= N_OUT_PAD
    agent_id = x1['agent_id']
    x_local = x1['local']
    non_agents_local = x2['local']

    env_batch_n_non_agents = non_agents_local.shape[:-3]
    non_agents_logits = jnp.zeros(env_batch_n_non_agents + (1,), dtype=x_local.dtype)

    env_batch_nagents = x_local.shape[:-3]
    timeseries, movement, _feature_num = x_local.shape[-3:]
    k_feats = timeseries * movement
    assert k_feats == K_IN, "fc1 expects 60 input features (timeseries*movement)"

    # x_local[..., 0] flattened to (B, 60); stored bf16 to halve kernel input DMA.
    x_flat = x_local[..., 0].reshape(-1, k_feats).astype(jnp.bfloat16)
    ids = agent_id.reshape(-1, 1).astype(jnp.int32)
    B = x_flat.shape[0]

    b_blk = _pick_block(B)
    b_pad = pl.cdiv(B, b_blk) * b_blk

    # Zero-pad features 60 -> 64 lanes and the batch to a multiple of b_blk.
    x_in = jnp.pad(x_flat, ((0, b_pad - B), (0, K_IN_PAD - k_feats)))
    id_in = jnp.pad(ids, ((0, b_pad - B), (0, 0)))          # padded rows -> id 0

    w1p, embp, p1, w2, p2, w3, p3, w4p, b4p = _pack_params(params, action_size)

    def resident(shape):
        # Constant block index every grid step -> stays VMEM-resident (no re-DMA).
        return pl.BlockSpec(shape, lambda i: (0, 0))

    flops = 2 * b_pad * (K_IN_PAD * 256 + NUM_ID_PAD * 256
                         + 256 * 128 + 128 * 64 + 64 * N_OUT_PAD)
    weight_bytes = 2 * (K_IN_PAD * 256 + NUM_ID_PAD * EMB_DIM + 256 * 128
                        + 128 * 64 + 64 * N_OUT_PAD) \
        + 4 * (3 * 256 + 3 * 128 + 3 * 64 + N_OUT_PAD)
    bytes_accessed = (b_pad * (K_IN_PAD * 2 + 4 + N_OUT_PAD * 2)) + weight_bytes
    cost = pl.CostEstimate(flops=flops, transcendentals=3 * b_pad,
                           bytes_accessed=int(bytes_accessed))

    out = pl.pallas_call(
        actor_kernel,
        out_shape=jax.ShapeDtypeStruct((b_pad, N_OUT_PAD), jnp.bfloat16),
        grid=(b_pad // b_blk,),
        in_specs=[
            pl.BlockSpec((b_blk, K_IN_PAD), lambda i: (i, 0)),   # x (pipelined)
            pl.BlockSpec((b_blk, 1), lambda i: (i, 0)),          # agent ids
            resident((K_IN_PAD, 256)),                           # fc1 weight
            resident((NUM_ID_PAD, EMB_DIM)),                     # embedding table
            resident((3, 256)),                                  # b1/g1/beta1
            resident((256, 128)), resident((3, 128)),            # fc2
            resident((128, 64)), resident((3, 64)),              # fc3
            resident((64, N_OUT_PAD)), resident((1, N_OUT_PAD)), # fc4 (lane-dense)
        ],
        out_specs=pl.BlockSpec((b_blk, N_OUT_PAD), lambda i: (i, 0)),
        compiler_params=pltpu.CompilerParams(
            dimension_semantics=("parallel",),
            vmem_limit_bytes=32 * 1024 * 1024),
        cost_estimate=cost,
    )(x_in, id_in, w1p, embp, p1, w2, p2, w3, p3, w4p, b4p)

    logits = out[:B, :action_size].astype(x_local.dtype)
    logits = logits.reshape(env_batch_nagents + (action_size,))
    return {('agents', 'logits'): logits,
            ('non_agents', 'logits'): non_agents_logits}


def _reference_forward(x1, x2, params, action_size=ACTION_SIZE):
    """Pure-JAX f32 reference mirroring the PyTorch module (correctness check)."""
    x_local = x1['local']
    timeseries, movement, _f = x_local.shape[-3:]
    env_batch_nagents = x_local.shape[:-3]
    x = x_local[..., 0].reshape(-1, timeseries * movement).astype(jnp.float32)
    ids = x1['agent_id'].reshape(-1).astype(jnp.int32)
    emb = params['emb'][ids]

    def ln(h, g, b):
        mean = jnp.mean(h, axis=-1, keepdims=True)
        var = jnp.mean((h - mean) ** 2, axis=-1, keepdims=True)
        return (h - mean) * jax.lax.rsqrt(var + LN_EPS) * g + b

    h = x @ params['w1'] + params['b1']
    h = jnp.maximum(ln(h + emb, params['g1'], params['be1']), 0.0)
    h = jnp.maximum(ln(h @ params['w2'] + params['b2'], params['g2'], params['be2']), 0.0)
    h = jnp.maximum(ln(h @ params['w3'] + params['b3'], params['g3'], params['be3']), 0.0)
    h = h @ params['w4'] + params['b4']
    return h.reshape(env_batch_nagents + (action_size,))


def _run_case(params, key, env, n_agents, n_non_agents,
              timeseries=12, movement=5, feature_num=4, tol=6e-2):
    k_x, k_id, k_non = jax.random.split(key, 3)
    x_local = jax.random.normal(
        k_x, (env, n_agents, timeseries, movement, feature_num), jnp.float32)
    agent_id = jax.random.randint(k_id, (env, n_agents), 0, NUM_AGENT_IDS, jnp.int32)
    non_agents_local = jax.random.normal(
        k_non, (env, n_non_agents, timeseries, movement, feature_num), jnp.float32)

    x1 = {'agent_id': agent_id, 'local': x_local}
    x2 = {'local': non_agents_local}

    output = actor_network_forward(x1, x2, params, ACTION_SIZE)
    logits = jax.block_until_ready(output[('agents', 'logits')])
    jax.block_until_ready(output[('non_agents', 'logits')])

    assert logits.shape == (env, n_agents, ACTION_SIZE)
    assert output[('non_agents', 'logits')].shape == (env, n_non_agents, 1)

    ref = jax.block_until_ready(_reference_forward(x1, x2, params, ACTION_SIZE))
    # bf16 matmul operands -> expected precision delta vs. the f32 reference.
    max_err = float(jnp.max(jnp.abs(logits.astype(jnp.float32) - ref)))
    assert max_err < tol, f"mismatch vs reference: {max_err}"


if __name__ == "__main__":
    key = jax.random.PRNGKey(0)
    k_par, k_small, k_big = jax.random.split(key, 3)
    params = init_params(k_par, ACTION_SIZE)

    # Small case: 2 envs x 3 agents (single grid block).
    _run_case(params, k_small, env=2, n_agents=3, n_non_agents=4)
    # Mid case: 8 envs x 40 agents = 320 rows -> >= 2 grid steps (pipelined path,
    # batch padding, both TensorCores on v7x).
    _run_case(params, k_big, env=8, n_agents=40, n_non_agents=4)

    print("KERNEL_OK")
</pallas_src>

<mosaic_0001>
module attributes {stable_mosaic.version = 11 : i64} {
  func.func @actor_kernel(%arg0: i32, %arg1: memref<16x64xbf16, #tpu.memory_space<vmem>>, %arg2: memref<16x1xi32, #tpu.memory_space<vmem>>, %arg3: memref<64x256xbf16, #tpu.memory_space<vmem>>, %arg4: memref<8x256xbf16, #tpu.memory_space<vmem>>, %arg5: memref<3x256xf32, #tpu.memory_space<vmem>>, %arg6: memref<256x128xbf16, #tpu.memory_space<vmem>>, %arg7: memref<3x128xf32, #tpu.memory_space<vmem>>, %arg8: memref<128x64xbf16, #tpu.memory_space<vmem>>, %arg9: memref<3x64xf32, #tpu.memory_space<vmem>>, %arg10: memref<64x128xbf16, #tpu.memory_space<vmem>>, %arg11: memref<1x128xf32, #tpu.memory_space<vmem>>, %arg12: memref<16x128xbf16, #tpu.memory_space<vmem>>) attributes {dimension_semantics = [#tpu.dimension_semantics<parallel>], iteration_bounds = array<i64: 1>, scalar_prefetch = 0 : i64, scratch_operands = 0 : i64, tpu.core_type = #tpu.core_type<tc>, window_params = [{transform_indices = @transform_0, window_bounds = array<i64: 16, 64>}, {transform_indices = @transform_1, window_bounds = array<i64: 16, 1>}, {pipeline_mode = #tpu.pipeline_mode<synchronous>, transform_indices = @transform_2, window_bounds = array<i64: 64, 256>}, {pipeline_mode = #tpu.pipeline_mode<synchronous>, transform_indices = @transform_3, window_bounds = array<i64: 8, 256>}, {pipeline_mode = #tpu.pipeline_mode<synchronous>, transform_indices = @transform_4, window_bounds = array<i64: 3, 256>}, {pipeline_mode = #tpu.pipeline_mode<synchronous>, transform_indices = @transform_5, window_bounds = array<i64: 256, 128>}, {pipeline_mode = #tpu.pipeline_mode<synchronous>, transform_indices = @transform_6, window_bounds = array<i64: 3, 128>}, {pipeline_mode = #tpu.pipeline_mode<synchronous>, transform_indices = @transform_7, window_bounds = array<i64: 128, 64>}, {pipeline_mode = #tpu.pipeline_mode<synchronous>, transform_indices = @transform_8, window_bounds = array<i64: 3, 64>}, {pipeline_mode = #tpu.pipeline_mode<synchronous>, transform_indices = @transform_9, window_bounds = array<i64: 64, 128>}, {pipeline_mode = #tpu.pipeline_mode<synchronous>, transform_indices = @transform_10, window_bounds = array<i64: 1, 128>}, {transform_indices = @transform_11, window_bounds = array<i64: 16, 128>}]} {
    %c0 = arith.constant 0 : index
    %c0_0 = arith.constant 0 : index
    %0 = vector.load %arg1[%c0, %c0_0] : memref<16x64xbf16, #tpu.memory_space<vmem>>, vector<16x64xbf16>
    %c0_1 = arith.constant 0 : index
    %c0_2 = arith.constant 0 : index
    %1 = vector.load %arg2[%c0_1, %c0_2] : memref<16x1xi32, #tpu.memory_space<vmem>>, vector<16x1xi32>
    %2 = tpu.iota {dimensions = array<i32: 1>} : vector<16x8xi32>
    %3 = vector.broadcast %1 : vector<16x1xi32> to vector<16x8xi32>
    %4 = arith.cmpi eq, %2, %3 : vector<16x8xi32>
    %5 = arith.extui %4 : vector<16x8xi1> to vector<16x8xi32>
    %6 = arith.sitofp %5 : vector<16x8xi32> to vector<16x8xf32>
    %7 = arith.truncf %6 : vector<16x8xf32> to vector<16x8xbf16>
    %c0_3 = arith.constant 0 : index
    %c0_4 = arith.constant 0 : index
    %8 = vector.load %arg3[%c0_3, %c0_4] : memref<64x256xbf16, #tpu.memory_space<vmem>>, vector<64x256xbf16>
    %cst = arith.constant dense<0.000000e+00> : vector<16x256xf32>
    %9 = tpu.matmul %0, %8, %cst {dimension_numbers = #tpu.dot_dimension_numbers<[1], [0], [0], [1], [0, 0, 1, 1], [], []>} : vector<16x64xbf16>, vector<64x256xbf16>, vector<16x256xf32> -> vector<16x256xf32>
    %c0_5 = arith.constant 0 : index
    %c0_6 = arith.constant 0 : index
    %10 = vector.load %arg4[%c0_5, %c0_6] : memref<8x256xbf16, #tpu.memory_space<vmem>>, vector<8x256xbf16>
    %cst_7 = arith.constant dense<0.000000e+00> : vector<16x256xf32>
    %11 = tpu.matmul %7, %10, %cst_7 {dimension_numbers = #tpu.dot_dimension_numbers<[1], [0], [0], [1], [0, 0, 1, 1], [], []>} : vector<16x8xbf16>, vector<8x256xbf16>, vector<16x256xf32> -> vector<16x256xf32>
    %12 = arith.addf %9, %11 : vector<16x256xf32>
    %c0_8 = arith.constant 0 : index
    %c0_9 = arith.constant 0 : index
    %13 = vector.load %arg5[%c0_8, %c0_9] : memref<3x256xf32, #tpu.memory_space<vmem>>, vector<1x256xf32>
    %14 = vector.broadcast %13 : vector<1x256xf32> to vector<16x256xf32>
    %15 = arith.addf %12, %14 : vector<16x256xf32>
    %c1 = arith.constant 1 : index
    %c0_10 = arith.constant 0 : index
    %16 = vector.load %arg5[%c1, %c0_10] : memref<3x256xf32, #tpu.memory_space<vmem>>, vector<1x256xf32>
    %c2 = arith.constant 2 : index
    %c0_11 = arith.constant 0 : index
    %17 = vector.load %arg5[%c2, %c0_11] : memref<3x256xf32, #tpu.memory_space<vmem>>, vector<1x256xf32>
    %cst_12 = arith.constant dense<0.000000e+00> : vector<16xf32>
    %18 = vector.multi_reduction <add>, %15, %cst_12 [1] : vector<16x256xf32> to vector<16xf32>
    %19 = vector.shape_cast %18 : vector<16xf32> to vector<16x1xf32>
    %cst_13 = arith.constant 2.560000e+02 : f32
    %20 = vector.broadcast %cst_13 : f32 to vector<16x1xf32>
    %21 = arith.divf %19, %20 : vector<16x1xf32>
    %22 = arith.mulf %15, %15 : vector<16x256xf32>
    %cst_14 = arith.constant dense<0.000000e+00> : vector<16xf32>
    %23 = vector.multi_reduction <add>, %22, %cst_14 [1] : vector<16x256xf32> to vector<16xf32>
    %24 = vector.shape_cast %23 : vector<16xf32> to vector<16x1xf32>
    %cst_15 = arith.constant 2.560000e+02 : f32
    %25 = vector.broadcast %cst_15 : f32 to vector<16x1xf32>
    %26 = arith.divf %24, %25 : vector<16x1xf32>
    %27 = arith.mulf %21, %21 : vector<16x1xf32>
    %28 = arith.subf %26, %27 : vector<16x1xf32>
    %cst_16 = arith.constant 9.99999974E-6 : f32
    %29 = vector.broadcast %cst_16 : f32 to vector<16x1xf32>
    %30 = arith.addf %28, %29 : vector<16x1xf32>
    %31 = math.rsqrt %30 : vector<16x1xf32>
    %32 = vector.broadcast %21 : vector<16x1xf32> to vector<16x256xf32>
    %33 = arith.subf %15, %32 : vector<16x256xf32>
    %34 = vector.broadcast %31 : vector<16x1xf32> to vector<16x256xf32>
    %35 = arith.mulf %33, %34 : vector<16x256xf32>
    %36 = vector.broadcast %16 : vector<1x256xf32> to vector<16x256xf32>
    %37 = arith.mulf %35, %36 : vector<16x256xf32>
    %38 = vector.broadcast %17 : vector<1x256xf32> to vector<16x256xf32>
    %39 = arith.addf %37, %38 : vector<16x256xf32>
    %cst_17 = arith.constant 0.000000e+00 : f32
    %40 = vector.broadcast %cst_17 : f32 to vector<16x256xf32>
    %41 = arith.maximumf %39, %40 : vector<16x256xf32>
    %42 = arith.truncf %41 : vector<16x256xf32> to vector<16x256xbf16>
    %c0_18 = arith.constant 0 : index
    %c0_19 = arith.constant 0 : index
    %43 = vector.load %arg6[%c0_18, %c0_19] : memref<256x128xbf16, #tpu.memory_space<vmem>>, vector<256x128xbf16>
    %cst_20 = arith.constant dense<0.000000e+00> : vector<16x128xf32>
    %44 = tpu.matmul %42, %43, %cst_20 {dimension_numbers = #tpu.dot_dimension_numbers<[1], [0], [0], [1], [0, 0, 1, 1], [], []>} : vector<16x256xbf16>, vector<256x128xbf16>, vector<16x128xf32> -> vector<16x128xf32>
    %c0_21 = arith.constant 0 : index
    %c0_22 = arith.constant 0 : index
    %45 = vector.load %arg7[%c0_21, %c0_22] : memref<3x128xf32, #tpu.memory_space<vmem>>, vector<1x128xf32>
    %46 = vector.broadcast %45 : vector<1x128xf32> to vector<16x128xf32>
    %47 = arith.addf %44, %46 : vector<16x128xf32>
    %c1_23 = arith.constant 1 : index
    %c0_24 = arith.constant 0 : index
    %48 = vector.load %arg7[%c1_23, %c0_24] : memref<3x128xf32, #tpu.memory_space<vmem>>, vector<1x128xf32>
    %c2_25 = arith.constant 2 : index
    %c0_26 = arith.constant 0 : index
    %49 = vector.load %arg7[%c2_25, %c0_26] : memref<3x128xf32, #tpu.memory_space<vmem>>, vector<1x128xf32>
    %cst_27 = arith.constant dense<0.000000e+00> : vector<16xf32>
    %50 = vector.multi_reduction <add>, %47, %cst_27 [1] : vector<16x128xf32> to vector<16xf32>
    %51 = vector.shape_cast %50 : vector<16xf32> to vector<16x1xf32>
    %cst_28 = arith.constant 1.280000e+02 : f32
    %52 = vector.broadcast %cst_28 : f32 to vector<16x1xf32>
    %53 = arith.divf %51, %52 : vector<16x1xf32>
    %54 = arith.mulf %47, %47 : vector<16x128xf32>
    %cst_29 = arith.constant dense<0.000000e+00> : vector<16xf32>
    %55 = vector.multi_reduction <add>, %54, %cst_29 [1] : vector<16x128xf32> to vector<16xf32>
    %56 = vector.shape_cast %55 : vector<16xf32> to vector<16x1xf32>
    %cst_30 = arith.constant 1.280000e+02 : f32
    %57 = vector.broadcast %cst_30 : f32 to vector<16x1xf32>
    %58 = arith.divf %56, %57 : vector<16x1xf32>
    %59 = arith.mulf %53, %53 : vector<16x1xf32>
    %60 = arith.subf %58, %59 : vector<16x1xf32>
    %cst_31 = arith.constant 9.99999974E-6 : f32
    %61 = vector.broadcast %cst_31 : f32 to vector<16x1xf32>
    %62 = arith.addf %60, %61 : vector<16x1xf32>
    %63 = math.rsqrt %62 : vector<16x1xf32>
    %64 = vector.broadcast %53 : vector<16x1xf32> to vector<16x128xf32>
    %65 = arith.subf %47, %64 : vector<16x128xf32>
    %66 = vector.broadcast %63 : vector<16x1xf32> to vector<16x128xf32>
    %67 = arith.mulf %65, %66 : vector<16x128xf32>
    %68 = vector.broadcast %48 : vector<1x128xf32> to vector<16x128xf32>
    %69 = arith.mulf %67, %68 : vector<16x128xf32>
    %70 = vector.broadcast %49 : vector<1x128xf32> to vector<16x128xf32>
    %71 = arith.addf %69, %70 : vector<16x128xf32>
    %cst_32 = arith.constant 0.000000e+00 : f32
    %72 = vector.broadcast %cst_32 : f32 to vector<16x128xf32>
    %73 = arith.maximumf %71, %72 : vector<16x128xf32>
    %74 = arith.truncf %73 : vector<16x128xf32> to vector<16x128xbf16>
    %c0_33 = arith.constant 0 : index
    %c0_34 = arith.constant 0 : index
    %75 = vector.load %arg8[%c0_33, %c0_34] : memref<128x64xbf16, #tpu.memory_space<vmem>>, vector<128x64xbf16>
    %cst_35 = arith.constant dense<0.000000e+00> : vector<16x64xf32>
    %76 = tpu.matmul %74, %75, %cst_35 {dimension_numbers = #tpu.dot_dimension_numbers<[1], [0], [0], [1], [0, 0, 1, 1], [], []>} : vector<16x128xbf16>, vector<128x64xbf16>, vector<16x64xf32> -> vector<16x64xf32>
    %c0_36 = arith.constant 0 : index
    %c0_37 = arith.constant 0 : index
    %77 = vector.load %arg9[%c0_36, %c0_37] : memref<3x64xf32, #tpu.memory_space<vmem>>, vector<1x64xf32>
    %78 = vector.broadcast %77 : vector<1x64xf32> to vector<16x64xf32>
    %79 = arith.addf %76, %78 : vector<16x64xf32>
    %c1_38 = arith.constant 1 : index
    %c0_39 = arith.constant 0 : index
    %80 = vector.load %arg9[%c1_38, %c0_39] : memref<3x64xf32, #tpu.memory_space<vmem>>, vector<1x64xf32>
    %c2_40 = arith.constant 2 : index
    %c0_41 = arith.constant 0 : index
    %81 = vector.load %arg9[%c2_40, %c0_41] : memref<3x64xf32, #tpu.memory_space<vmem>>, vector<1x64xf32>
    %cst_42 = arith.constant dense<0.000000e+00> : vector<16xf32>
    %82 = vector.multi_reduction <add>, %79, %cst_42 [1] : vector<16x64xf32> to vector<16xf32>
    %83 = vector.shape_cast %82 : vector<16xf32> to vector<16x1xf32>
    %cst_43 = arith.constant 6.400000e+01 : f32
    %84 = vector.broadcast %cst_43 : f32 to vector<16x1xf32>
    %85 = arith.divf %83, %84 : vector<16x1xf32>
    %86 = arith.mulf %79, %79 : vector<16x64xf32>
    %cst_44 = arith.constant dense<0.000000e+00> : vector<16xf32>
    %87 = vector.multi_reduction <add>, %86, %cst_44 [1] : vector<16x64xf32> to vector<16xf32>
    %88 = vector.shape_cast %87 : vector<16xf32> to vector<16x1xf32>
    %cst_45 = arith.constant 6.400000e+01 : f32
    %89 = vector.broadcast %cst_45 : f32 to vector<16x1xf32>
    %90 = arith.divf %88, %89 : vector<16x1xf32>
    %91 = arith.mulf %85, %85 : vector<16x1xf32>
    %92 = arith.subf %90, %91 : vector<16x1xf32>
    %cst_46 = arith.constant 9.99999974E-6 : f32
    %93 = vector.broadcast %cst_46 : f32 to vector<16x1xf32>
    %94 = arith.addf %92, %93 : vector<16x1xf32>
    %95 = math.rsqrt %94 : vector<16x1xf32>
    %96 = vector.broadcast %85 : vector<16x1xf32> to vector<16x64xf32>
    %97 = arith.subf %79, %96 : vector<16x64xf32>
    %98 = vector.broadcast %95 : vector<16x1xf32> to vector<16x64xf32>
    %99 = arith.mulf %97, %98 : vector<16x64xf32>
    %100 = vector.broadcast %80 : vector<1x64xf32> to vector<16x64xf32>
    %101 = arith.mulf %99, %100 : vector<16x64xf32>
    %102 = vector.broadcast %81 : vector<1x64xf32> to vector<16x64xf32>
    %103 = arith.addf %101, %102 : vector<16x64xf32>
    %cst_47 = arith.constant 0.000000e+00 : f32
    %104 = vector.broadcast %cst_47 : f32 to vector<16x64xf32>
    %105 = arith.maximumf %103, %104 : vector<16x64xf32>
    %106 = arith.truncf %105 : vector<16x64xf32> to vector<16x64xbf16>
    %c0_48 = arith.constant 0 : index
    %c0_49 = arith.constant 0 : index
    %107 = vector.load %arg10[%c0_48, %c0_49] : memref<64x128xbf16, #tpu.memory_space<vmem>>, vector<64x128xbf16>
    %cst_50 = arith.constant dense<0.000000e+00> : vector<16x128xf32>
    %108 = tpu.matmul %106, %107, %cst_50 {dimension_numbers = #tpu.dot_dimension_numbers<[1], [0], [0], [1], [0, 0, 1, 1], [], []>} : vector<16x64xbf16>, vector<64x128xbf16>, vector<16x128xf32> -> vector<16x128xf32>
    %c0_51 = arith.constant 0 : index
    %c0_52 = arith.constant 0 : index
    %109 = vector.load %arg11[%c0_51, %c0_52] : memref<1x128xf32, #tpu.memory_space<vmem>>, vector<1x128xf32>
    %110 = vector.broadcast %109 : vector<1x128xf32> to vector<16x128xf32>
    %111 = arith.addf %108, %110 : vector<16x128xf32>
    %112 = arith.truncf %111 : vector<16x128xf32> to vector<16x128xbf16>
    %c0_53 = arith.constant 0 : index
    %c0_54 = arith.constant 0 : index
    %113 = vector.load %arg12[%c0_53, %c0_54] : memref<16x128xbf16, #tpu.memory_space<vmem>>, vector<16x128xbf16>
    tpu.vector_store %arg12[%c0_53, %c0_54], %112 {strides = array<i32>} : memref<16x128xbf16, #tpu.memory_space<vmem>>, vector<16x128xbf16>,
    return
  }
  func.func @transform_0(%arg0: i32) -> (i32, i32) {
    %c0_i32 = arith.constant 0 : i32
    %c0_i32_0 = arith.constant 0 : i32
    return %arg0, %c0_i32 : i32, i32
  }
  func.func @transform_1(%arg0: i32) -> (i32, i32) {
    %c0_i32 = arith.constant 0 : i32
    %c0_i32_0 = arith.constant 0 : i32
    return %arg0, %c0_i32 : i32, i32
  }
  func.func @transform_2(%arg0: i32) -> (i32, i32) {
    %c0_i32 = arith.constant 0 : i32
    %c0_i32_0 = arith.constant 0 : i32
    %c0_i32_1 = arith.constant 0 : i32
    return %c0_i32, %c0_i32_0 : i32, i32
  }
  func.func @transform_3(%arg0: i32) -> (i32, i32) {
    %c0_i32 = arith.constant 0 : i32
    %c0_i32_0 = arith.constant 0 : i32
    %c0_i32_1 = arith.constant 0 : i32
    return %c0_i32, %c0_i32_0 : i32, i32
  }
  func.func @transform_4(%arg0: i32) -> (i32, i32) {
    %c0_i32 = arith.constant 0 : i32
    %c0_i32_0 = arith.constant 0 : i32
    %c0_i32_1 = arith.constant 0 : i32
    return %c0_i32, %c0_i32_0 : i32, i32
  }
  func.func @transform_5(%arg0: i32) -> (i32, i32) {
    %c0_i32 = arith.constant 0 : i32
    %c0_i32_0 = arith.constant 0 : i32
    %c0_i32_1 = arith.constant 0 : i32
    return %c0_i32, %c0_i32_0 : i32, i32
  }
  func.func @transform_6(%arg0: i32) -> (i32, i32) {
    %c0_i32 = arith.constant 0 : i32
    %c0_i32_0 = arith.constant 0 : i32
    %c0_i32_1 = arith.constant 0 : i32
    return %c0_i32, %c0_i32_0 : i32, i32
  }
  func.func @transform_7(%arg0: i32) -> (i32, i32) {
    %c0_i32 = arith.constant 0 : i32
    %c0_i32_0 = arith.constant 0 : i32
    %c0_i32_1 = arith.constant 0 : i32
    return %c0_i32, %c0_i32_0 : i32, i32
  }
  func.func @transform_8(%arg0: i32) -> (i32, i32) {
    %c0_i32 = arith.constant 0 : i32
    %c0_i32_0 = arith.constant 0 : i32
    %c0_i32_1 = arith.constant 0 : i32
    return %c0_i32, %c0_i32_0 : i32, i32
  }
  func.func @transform_9(%arg0: i32) -> (i32, i32) {
    %c0_i32 = arith.constant 0 : i32
    %c0_i32_0 = arith.constant 0 : i32
    %c0_i32_1 = arith.constant 0 : i32
    return %c0_i32, %c0_i32_0 : i32, i32
  }
  func.func @transform_10(%arg0: i32) -> (i32, i32) {
    %c0_i32 = arith.constant 0 : i32
    %c0_i32_0 = arith.constant 0 : i32
    %c0_i32_1 = arith.constant 0 : i32
    return %c0_i32, %c0_i32_0 : i32, i32
  }
  func.func @transform_11(%arg0: i32) -> (i32, i32) {
    %c0_i32 = arith.constant 0 : i32
    %c0_i32_0 = arith.constant 0 : i32
    return %arg0, %c0_i32 : i32, i32
  }
}

</mosaic_0001>

<bundles_post_ra>
// kernel: tpu_custom_call.1
= control target key start
LH: loop header
LB: loop body
LE: loop exit
PB: predicated region body
PF: predicated region fallthrough
CT: control target
= control target key end

     0   :  { %16 = vsyncpa [#allocation3], 0  ;;  %s1318_s0 = inlined_call_operand.vmem [shape: bf16[16,64], index: 0, kind: input, shape index: {}]   ;;  %s1319_s1 = inlined_call_operand.vmem [shape: s32[16,1], index: 1, kind: input, shape index: {}]   ;;  %s1320_s2 = inlined_call_operand.vmem [shape: bf16[64,256], index: 2, kind: input, shape index: {}]   ;;  %s1321_s3 = inlined_call_operand.vmem [shape: bf16[8,256], index: 3, kind: input, shape index: {}]   ;;  %s1322_s4 = inlined_call_operand.vmem [shape: f32[3,256], index: 4, kind: input, shape index: {}]   ;;  %s1323_s5 = inlined_call_operand.hbm [shape: bf16[256,128], index: 5, kind: input, shape index: {}]   ;;  %s1324_s6 = inlined_call_operand.hbm [shape: f32[3,128], index: 6, kind: input, shape index: {}]   ;;  %s1325_s7 = inlined_call_operand.vmem [shape: bf16[128,64], index: 7, kind: input, shape index: {}]   ;;  %s1326_s8 = inlined_call_operand.vmem [shape: f32[3,64], index: 8, kind: input, shape index: {}]   ;;  %s1327_s9 = inlined_call_operand.vmem [shape: bf16[64,128], index: 9, kind: input, shape index: {}]   ;;  %s1328_s10 = inlined_call_operand.vmem [shape: f32[1,128], index: 10, kind: input, shape index: {}]   ;;  %s1329_s11 = inlined_call_operand.hbm [shape: bf16[16,128], index: 11, kind: output, shape index: {}]  }
   0x1   :  { %17 = vsyncpa [#allocation6], 0 }
   0x2   :  { %18 = vsyncpa [#allocation4], 0  ;;  %s1086_s17 = smov [#allocation2]  }
   0x3   :  { %s34_s18 = sshll.u32 %s1086_s17, 4  ;;  %s35_s18 = int_to_ptr.vmem [resolvable:$true] %s34_s18 }
   0x4   :  { %s1028_s19 = scalar_lea.vmem %s35_s18, 2048  ;;  %p1033_p1 = scmp.lt.s32.totalorder %s35_s18, %s35_s18 }
   0x5   :  { %p1029_p0 = scmp.ne.s32.totalorder %s35_s18, %s1028_s19  ;;  %p1034_p2 = scmp.lt.s32.totalorder %s1028_s19, %s1028_s19 }
   0x7   :  { %p1035_p3 = por %p1034_p2, %p1033_p1 }
   0x9   :  { %p1036_p4 = pnand %p1035_p3, %p1029_p0 }
   0xb   :  { %1039 = shalt.err (!%p1036_p4)
}
   0xc   :  { %s1087_s20 = smov 64   ;;  %s1088_s21 = smov 4  }
   0xd   :  { %40 = dma.hbm_to_vmem [thread:$0]  %s1323_s5, 2048, %s35_s18, [#allocation3], %s1087_s20, %s1087_s20, %s1088_s21  }
   0xe   :  { %s1089_s24 = smov [#allocation5]  }
   0xf   :  { %s47_s25 = sshll.u32 %s1089_s24, 4  ;;  %s48_s25 = int_to_ptr.vmem [resolvable:$true] %s47_s25 }
  0x10   :  { %s1048_s26 = scalar_lea.vmem %s48_s25, 64  ;;  %p1053_p6 = scmp.lt.s32.totalorder %s48_s25, %s48_s25 }
  0x11   :  { %p1049_p5 = scmp.ne.s32.totalorder %s48_s25, %s1048_s26  ;;  %p1054_p7 = scmp.lt.s32.totalorder %s1048_s26, %s1048_s26 }
  0x13   :  { %p1055_p8 = por %p1054_p7, %p1053_p6 }
  0x15   :  { %p1056_p9 = pnand %p1055_p8, %p1049_p5 }
  0x17   :  { %1059 = shalt.err (!%p1056_p9)
}
  0x18   :  { %50 = dma.hbm_to_vmem [thread:$0]  %s1324_s6, 64, %s48_s25, [#allocation6]  }
  0x19   :  { %1080 = dma.done.wait [#allocation3], 2048  }
  0x1a   :  { %1081 = vsyncadd [#allocation3], 4294965248 }
  0x1b   :  { %1082 = dma.done.wait [#allocation6], 64  }
  0x1c   :  { %1083 = vsyncadd [#allocation6], 4294967232  ;;  %v1090_v0 = vmov 0   ;;  %v68_v1 = vld [vmem:[%s1319_s1] sm:$0xff]  ;;  %v69_v2 = vld [vmem:[%s1319_s1 + $0x8] sm:$0xff]  ;;  %vm103_vm0 = vcmask 1043456   ;;  %v70_v17 = vlaneseq }
  0x1d   :  { %964 = vset.pattern.permute.xlu0 %v1090_v0  ;;  %234 = vmatprep.mubr.bf16.mxu1 %v1090_v0  ;;  %v965_v3 = vld [vmem:[%s1320_s2 + $0x34] ss:$8 sps:$4 sm:$0xff]   ;;  %v967_v4 = vld [vmem:[%s1320_s2 + $0x30] ss:$8 sps:$4 sm:$0xff]   ;;  %v968_v5 = vld [vmem:[%s1320_s2 + $0x24] ss:$8 sps:$4 sm:$0xff]  }
  0x1e   :  { %142 = vmatprep.mubr.bf16.mxu0 %v1090_v0  ;;  %73 = vperm.xlu0 %964, %v68_v1   ;;  %v970_v6 = vld [vmem:[%s1320_s2 + $0x20] ss:$8 sps:$4 sm:$0xff]   ;;  %v971_v7 = vld [vmem:[%s1320_s2 + $0x14] ss:$8 sps:$4 sm:$0xff]   ;;  %v973_v8 = vld [vmem:[%s1320_s2 + $0x10] ss:$8 sps:$4 sm:$0xff]  }
  0x1f   :  { %210 = vmatprep.subr.bf16.mxu1 %v965_v3  ;;  %v974_v9 = vld [vmem:[%s1320_s2 + $0x4] ss:$8 sps:$4 sm:$0xff]   ;;  %v976_v13 = vld [vmem:[%s1320_s2] ss:$8 sps:$4 sm:$0xff]   ;;  %vm198_vm1 = vcmask 523264   ;;  %v1091_v16 = vmov 0.0  }
  0x20   :  { %211 = vmatpush1.bf16.msra.mxu1 %v967_v4  ;;  %v93_v10 = vld [vmem:[%s1321_s3] sm:$0xff]  ;;  %v71_v18 = vand.u32 127, %v70_v17  ;;  %vm99_vm4 = vcmask 64512   ;;  %v248_v24 = vshrl.u32 %v70_v17, 7  ;;  %v980_v54 = vld [vmem:[#allocation2 + $0x78] sm:$0xff]   ;;  %v982_v56 = vld [vmem:[#allocation2 + $0x70] sm:$0xff]  }
  0x21   :  { %212 = vmatprep.subr.bf16.mxu1 %v968_v5  ;;  %v828_v11 = vcombine.high %v93_v10, %v93_v10  ;;  %v827_v12 = vcombine.low %v93_v10, %v93_v10  ;;  %v977_v15 = vld [vmem:[%s1318_s0] sm:$0xff]   ;;  %v981_v55 = vld [vmem:[#allocation2 + $0x38] sm:$0xff]   ;;  %v983_v57 = vld [vmem:[#allocation2 + $0x30] sm:$0xff]   ;;  %vm1092_vm5 = vmmov 0   ;;  %s1093_s1 = smov [#allocation7]  }
  0x22   :  { %76 = vperm.xlu0 %964, %v69_v2   ;;  %v1203_v26 = vsub.s32 0, %v248_v24  ;;  %v245_v27 = vld [vmem:[%s1322_s4] ss:$4 sm:$0x3]  ;;  %v1208_v28 = vsub.s32 1, %v248_v24  ;;  %v984_v58 = vld [vmem:[#allocation2 + $0x68] sm:$0xff]  }
  0x23   :  { %829 = vmatprep.subr.msk.bf16.mxu0 %vm103_vm0, %v828_v11  ;;  %v105_v14 = vsel %vm103_vm0, %v827_v12, 0  ;;  %v985_v59 = vld [vmem:[#allocation2 + $0x28] sm:$0xff]   ;;  %v986_v60 = vld [vmem:[#allocation2 + $0x60] sm:$0xff]   ;;  %v988_v62 = vld [vmem:[#allocation2 + $0x58] sm:$0xff]   ;;  %s812_s22 = sshll.u32 %s1093_s1, 4  ;;  %s813_s22 = int_to_ptr.vmem [resolvable:$true] %s812_s22 }
  0x24   :  { %213 = vmatpush1.bf16.msra.mxu1 %v970_v6  ;;  %125 = vmatpush1.bf16.msra.mxu0 %v105_v14  ;;  %v250_v30 = vrot.slane %v245_v27, %v1203_v26  ;;  %v254_v33 = vrot.slane %v245_v27, %v1208_v28  ;;  %v987_v61 = vld [vmem:[#allocation2 + $0x20] sm:$0xff]   ;;  %v989_v63 = vld [vmem:[#allocation2 + $0x18] sm:$0xff]   ;;  %v990_v0 = vld [vmem:[#allocation2 + $0x50] sm:$0xff]   ;;  %p1065_p11 = scmp.lt.s32.totalorder %s813_s22, %s813_s22 }
  0x25   :  { %214 = vmatprep.subr.bf16.mxu1 %v971_v7  ;;  %888 = vmatprep.subr.bf16.mxu0 %v980_v54  ;;  %v991_v1 = vld [vmem:[#allocation2 + $0x10] sm:$0xff]   ;;  %v992_v2 = vld [vmem:[#allocation2 + $0x48] sm:$0xff]   ;;  %v994_v4 = vld [vmem:[#allocation2 + $0x40] sm:$0xff]  }
  0x26   :  { %v993_v3 = vld [vmem:[#allocation2 + $0x8] sm:$0xff]   ;;  %v995_v5 = vld [vmem:[#allocation2] sm:$0xff]  }
  0x28   :  { %215 = vmatpush1.bf16.msra.mxu1 %v973_v8 }
  0x29   :  { %216 = vmatprep.subr.bf16.mxu1 %v974_v9 }
  0x2c   :  { %217 = vmatpush1.bf16.msra.mxu1 %v976_v13 }
  0x2d   :  { %924 = vmatprep.subr.bf16.mxu1 %v1091_v16 }
  0x2f   :  { %840 = vmatmul.mubr.msk.bf16.vlgmr.msra.gmra.mxu1 %vm198_vm1, %v977_v15 }
  0x30   :  { %940 = vmatprep.mubr.msk.bf16.mxu1 %vm1092_vm5, %v1091_v16 }
  0x99   :  { %v74_v19 = vpop.permute.xlu0 %73 }
  0x9a   :  { %vm78_vm2 = vcmp.eq.s32.totalorder %v71_v18, %v74_v19 }
  0x9b   :  { %v825_v21 = vsel %vm78_vm2, 1.0, %v1091_v16 }
  0x9d   :  { %v77_v20 = vpop.permute.xlu0 %76 }
  0x9e   :  { %vm79_vm3 = vcmp.eq.s32.totalorder %v71_v18, %v77_v20 }
  0x9f   :  { %v826_v22 = vsel %vm79_vm3, 1.0, %v1091_v16 }
  0xa0   :  { %v84_v23 = vpack.c.bf16 %v826_v22, %v825_v21  ;;  %v841_v21 = vld [vmem:[%s1322_s4 + $0x1] ss:$4 sm:$0x3] }
  0xa2   :  { %830 = vmatmul.mubr.msk.bf16.vlgmr.msra.gmra.mxu0 %vm99_vm4, %v84_v23 }
  0xa3   :  { %889 = vmatpush3.bf16.msra.mxu0 %v981_v55 }
  0xa4   :  { %890 = vmatprep.subr.bf16.mxu0 %v982_v56 }
  0xa7   :  { %891 = vmatpush3.bf16.msra.mxu0 %v983_v57 }
  0xa8   :  { %892 = vmatprep.subr.bf16.mxu0 %v984_v58 }
  0xab   :  { %893 = vmatpush3.bf16.msra.mxu0 %v985_v59 }
  0xac   :  { %894 = vmatprep.subr.bf16.mxu0 %v986_v60 }
  0xaf   :  { %895 = vmatpush3.bf16.msra.mxu0 %v987_v61 }
  0xb0   :  { %896 = vmatprep.subr.bf16.mxu0 %v988_v62  ;;  %v996_v62 = vld [vmem:[%s1325_s7 + $0x38] sm:$0xff]  }
  0xb1   :  { %925 = vmatpush3.bf16.msra.mxu1 %v996_v62 }
  0xb2   :  { %926 = vmatprep.subr.bf16.mxu1 %v1091_v16 }
  0xb3   :  { %897 = vmatpush3.bf16.msra.mxu0 %v989_v63  ;;  %v997_v63 = vld [vmem:[%s1325_s7 + $0x30] sm:$0xff]  }
  0xb4   :  { %898 = vmatprep.subr.bf16.mxu0 %v990_v0  ;;  %v998_v0 = vld [vmem:[%s1325_s7 + $0x28] sm:$0xff]  }
  0xb5   :  { %927 = vmatpush3.bf16.msra.mxu1 %v997_v63 }
  0xb6   :  { %928 = vmatprep.subr.bf16.mxu1 %v1091_v16 }
  0xb7   :  { %899 = vmatpush3.bf16.msra.mxu0 %v991_v1  ;;  %v999_v1 = vld [vmem:[%s1325_s7 + $0x20] sm:$0xff]  }
  0xb8   :  { %900 = vmatprep.subr.bf16.mxu0 %v992_v2  ;;  %v1000_v2 = vld [vmem:[%s1325_s7 + $0x18] sm:$0xff]  }
  0xb9   :  { %929 = vmatpush3.bf16.msra.mxu1 %v998_v0 }
  0xba   :  { %930 = vmatprep.subr.bf16.mxu1 %v1091_v16 }
  0xbb   :  { %901 = vmatpush3.bf16.msra.mxu0 %v993_v3  ;;  %v1001_v3 = vld [vmem:[%s1325_s7 + $0x10] sm:$0xff]  }
  0xbc   :  { %902 = vmatprep.subr.bf16.mxu0 %v994_v4  ;;  %v1002_v4 = vld [vmem:[%s1325_s7 + $0x8] sm:$0xff]  }
  0xbd   :  { %931 = vmatpush3.bf16.msra.mxu1 %v999_v1 }
  0xbe   :  { %932 = vmatprep.subr.bf16.mxu1 %v1091_v16 }
  0xbf   :  { %903 = vmatpush3.bf16.msra.mxu0 %v995_v5  ;;  %v1003_v5 = vld [vmem:[%s1325_s7] sm:$0xff]  }
  0xc0   :  { %944 = vmatprep.subr.bf16.mxu0 %v1091_v16 }
  0xc1   :  { %933 = vmatpush3.bf16.msra.mxu1 %v1000_v2 }
  0xc2   :  { %934 = vmatprep.subr.bf16.mxu1 %v1091_v16 }
  0xc5   :  { %935 = vmatpush3.bf16.msra.mxu1 %v1001_v3 }
  0xc6   :  { %936 = vmatprep.subr.bf16.mxu1 %v1091_v16 }
  0xc9   :  { %937 = vmatpush3.bf16.msra.mxu1 %v1002_v4 }
  0xca   :  { %938 = vmatprep.subr.bf16.mxu1 %v1091_v16 }
  0xcd   :  { %939 = vmatpush3.bf16.msra.mxu1 %v1003_v5 }
  0xef   :  { %v236_v25 = vpop.f32.mrf.mxu1 }
  0xf1   :  { %v238_v29 = vpop.f32.mrf.mxu1 }
  0xf3   :  { %v240_v34 = vpop.f32.mrf.mxu1 }
  0xf5   :  { %v242_v41 = vpop.f32.mrf.mxu1 }
 0x162   :  { %v144_v31 = vpop.f32.mrf.mxu0 }
 0x163   :  { %v237_v32 = vadd.f32 %v236_v25, %v144_v31  ;;  %v842_v25 = vld [vmem:[%s1322_s4 + $0x2] ss:$4 sm:$0x3] }
 0x164   :  { %v146_v35 = vpop.f32.mrf.mxu0 }
 0x165   :  { %v1212_v36 = vadd.f32 %v250_v30, %v237_v32  ;;  %v239_v37 = vadd.f32 %v238_v29, %v146_v35  ;;  %v306_v29 = vrot.slane %v841_v21, %v1203_v26  ;;  %v321_v32 = vrot.slane %v842_v25, %v1203_v26 }
 0x166   :  { %v148_v38 = vpop.f32.mrf.mxu0 }
 0x167   :  { %v1214_v39 = vadd.f32 %v254_v33, %v239_v37  ;;  %v241_v40 = vadd.f32 %v240_v34, %v148_v38  ;;  %v274_v45 = vmul.f32 %v1212_v36, %v1212_v36 }
 0x168   :  { %v150_v42 = vpop.f32.mrf.mxu0 }
 0x169   :  { %v243_v43 = vadd.f32 %v242_v41, %v150_v42  ;;  %v265_v44 = vadd.f32 %v1214_v39, %v1212_v36  ;;  %v275_v46 = vmul.f32 %v1214_v39, %v1214_v39  ;;  %v1222_v47 = vadd.f32 %v250_v30, %v241_v40 }
 0x16a   :  { %v310_v30 = vrot.slane %v841_v21, %v1208_v28 }
 0x16b   :  { %v1224_v48 = vadd.f32 %v254_v33, %v243_v43  ;;  %266 = vadd.xlane.f32.xlu1 %v265_v44  ;;  %v278_v49 = vadd.f32 %v275_v46, %v274_v45  ;;  %v276_v52 = vmul.f32 %v1222_v47, %v1222_v47  ;;  %v325_v33 = vrot.slane %v842_v25, %v1208_v28 }
 0x16d   :  { %279 = vadd.xlane.f32.xlu0 %v278_v49  ;;  %v268_v50 = vadd.f32 %v1224_v48, %v1222_v47  ;;  %v277_v51 = vmul.f32 %v1224_v48, %v1224_v48 }
 0x16f   :  { %269 = vadd.xlane.f32.xlu1 %v268_v50  ;;  %v281_v53 = vadd.f32 %v277_v51, %v276_v52 }
 0x173   :  { %282 = vadd.xlane.f32.xlu1 %v281_v53 }
 0x1f4   :  { %v267_v6 = vpop.xlane.xlu1 %266 }
 0x1f5   :  { %v272_v7 = vmul.f32 0.00390625, %v267_v6 }
 0x1f6   :  { %v280_v8 = vpop.xlane.xlu0 %279 }
 0x1f7   :  { %v284_v9 = vmul.f32 0.00390625, %v280_v8  ;;  %v286_v10 = vmul.f32 %v272_v7, %v272_v7  ;;  %v294_v22 = vsub.f32 %v1212_v36, %v272_v7  ;;  %v295_v23 = vsub.f32 %v1214_v39, %v272_v7 }
 0x1f8   :  { %v270_v11 = vpop.xlane.xlu1 %269 }
 0x1f9   :  { %v288_v12 = vsub.f32 %v284_v9, %v286_v10  ;;  %v273_v13 = vmul.f32 0.00390625, %v270_v11 }
 0x1fb   :  { %v290_v14 = vadd.f32 1e-05, %v288_v12  ;;  %v287_v17 = vmul.f32 %v273_v13, %v273_v13  ;;  %v296_v34 = vsub.f32 %v1222_v47, %v273_v13  ;;  %v297_v35 = vsub.f32 %v1224_v48, %v273_v13  ;;  %v843_v48 = vld [vmem:[#allocation5] ss:$0 sm:$0xff] }
 0x1fc   :  { %v283_v15 = vpop.xlane.xlu1 %282 }
 0x1fd   :  { %1008 = vrsqrt.f32 %v290_v14  ;;  %v285_v18 = vmul.f32 0.00390625, %v283_v15 }
 0x1ff   :  { %v289_v19 = vsub.f32 %v285_v18, %v287_v17 }
 0x201   :  { %v291_v20 = vadd.f32 1e-05, %v289_v19 }
 0x203   :  { %1010 = vrsqrt.f32 %v291_v20 }
 0x20a   :  { %v1009_v24 = vpop.eup %1008 }
 0x20b   :  { %v299_v27 = vmul.f32 %v1009_v24, %v295_v23  ;;  %v298_v31 = vmul.f32 %v1009_v24, %v294_v22  ;;  %v860_v24 = vld [vmem:[#allocation5 + $0x1] ss:$0 sm:$0xff] }
 0x20d   :  { %v314_v36 = vmul.f32 %v310_v30, %v299_v27  ;;  %v313_v37 = vmul.f32 %v306_v29, %v298_v31 }
 0x20f   :  { %v329_v42 = vadd.f32 %v325_v33, %v314_v36  ;;  %v328_v44 = vadd.f32 %v321_v32, %v313_v37 }
 0x210   :  { %v1011_v38 = vpop.eup %1010 }
 0x211   :  { %v301_v39 = vmul.f32 %v1011_v38, %v297_v35  ;;  %v300_v40 = vmul.f32 %v1011_v38, %v296_v34  ;;  %v333_v49 = vmax.f32 %v329_v42, 0.0  ;;  %v332_v26 = vmax.f32 %v328_v44, 0.0  ;;  %v862_v38 = vld [vmem:[%s1326_s8] ss:$0 sm:$0xff] }
 0x213   :  { %v316_v41 = vmul.f32 %v310_v30, %v301_v39  ;;  %v315_v43 = vmul.f32 %v306_v29, %v300_v40  ;;  %v861_v30 = vld [vmem:[#allocation5 + $0x2] ss:$0 sm:$0xff] }
 0x215   :  { %v331_v45 = vadd.f32 %v325_v33, %v316_v41  ;;  %v330_v46 = vadd.f32 %v321_v32, %v315_v43 }
 0x217   :  { %v335_v50 = vmax.f32 %v331_v45, 0.0  ;;  %v334_v51 = vmax.f32 %v330_v46, 0.0 }
 0x219   :  { %v337_v28 = vpack.c.bf16 %v335_v50, %v333_v49  ;;  %v336_v52 = vpack.c.bf16 %v334_v51, %v332_v26 }
 0x21b   :  { %503 = vmatprep.mubr.bf16.mxu0 %v337_v28  ;;  %v1004_v28 = vld [vmem:[%s1327_s9 + $0x18] sm:$0xff]  }
 0x21c   :  { %504 = vmatmul.mubr.bf16.vlgmr.msra.gmra.mxu0 %v336_v52  ;;  %v1005_v52 = vld [vmem:[%s1327_s9 + $0x10] sm:$0xff]  }
 0x21d   :  { %952 = vmatprep.mubr.msk.bf16.mxu0 %vm1092_vm5, %v1091_v16  ;;  %945 = vmatpush3.bf16.msra.mxu0 %v1004_v28 }
 0x21e   :  { %946 = vmatprep.subr.bf16.mxu0 %v1091_v16 }
 0x221   :  { %947 = vmatpush3.bf16.msra.mxu0 %v1005_v52 }
 0x222   :  { %948 = vmatprep.subr.bf16.mxu0 %v1091_v16 }
 0x2dc   :  { %v904_v47 = vpop.f32.mrf.mxu0 }
 0x2de   :  { %v905_v53 = vpop.f32.mrf.mxu0 }
 0x2df   :  { %v906_v54 = vadd.f32 %v905_v53, %v904_v47  ;;  %v1006_v47 = vld [vmem:[%s1327_s9 + $0x8] sm:$0xff]  }
 0x2e0   :  { %v907_v55 = vpop.f32.mrf.mxu0  ;;  %949 = vmatpush3.bf16.msra.mxu0 %v1006_v47 }
 0x2e1   :  { %v506_v56 = vadd.f32 %v906_v54, %v843_v48  ;;  %950 = vmatprep.subr.bf16.mxu0 %v1091_v16  ;;  %v871_v16 = vld [vmem:[%s1326_s8 + $0x1] ss:$0 sm:$0xff] }
 0x2e2   :  { %v908_v57 = vpop.f32.mrf.mxu0 }
 0x2e3   :  { %514 = vadd.xlane.f32.xlu1 %v506_v56  ;;  %v909_v58 = vadd.f32 %v908_v57, %v907_v55  ;;  %v521_v59 = vmul.f32 %v506_v56, %v506_v56 }
 0x2e5   :  { %v509_v60 = vadd.f32 %v909_v58, %v843_v48  ;;  %v1007_v48 = vld [vmem:[%s1327_s9] sm:$0xff]  }
 0x2e6   :  { %951 = vmatpush3.bf16.msra.mxu0 %v1007_v48 }
 0x2e7   :  { %523 = vadd.xlane.f32.xlu1 %v521_v59  ;;  %v522_v61 = vmul.f32 %v509_v60, %v509_v60 }
 0x2eb   :  { %516 = vadd.xlane.f32.xlu1 %v509_v60 }
 0x2ef   :  { %525 = vadd.xlane.f32.xlu1 %v522_v61 }
 0x36c   :  { %v515_v6 = vpop.xlane.xlu1 %514 }
 0x36d   :  { %v519_v7 = vmul.f32 0.0078125, %v515_v6 }
 0x36f   :  { %v529_v9 = vmul.f32 %v519_v7, %v519_v7  ;;  %v537_v22 = vsub.f32 %v506_v56, %v519_v7 }
 0x370   :  { %v524_v8 = vpop.xlane.xlu1 %523 }
 0x371   :  { %v527_v10 = vmul.f32 0.0078125, %v524_v8  ;;  %v872_v8 = vld [vmem:[%s1326_s8 + $0x2] ss:$0 sm:$0xff]  ;;  %s1060_s8 = scalar_lea.vmem %s813_s22, 128 }
 0x372   :  { %p1061_p10 = scmp.ne.s32.totalorder %s813_s22, %s1060_s8  ;;  %p1066_p12 = scmp.lt.s32.totalorder %s1060_s8, %s1060_s8 }
 0x373   :  { %v531_v11 = vsub.f32 %v527_v10, %v529_v9 }
 0x374   :  { %v517_v12 = vpop.xlane.xlu1 %516  ;;  %p1067_p13 = por %p1066_p12, %p1065_p11 }
 0x375   :  { %v533_v13 = vadd.f32 1e-05, %v531_v11  ;;  %v520_v14 = vmul.f32 0.0078125, %v517_v12 }
 0x376   :  { %p1068_p0 = pnand %p1067_p13, %p1061_p10 }
 0x377   :  { %1012 = vrsqrt.f32 %v533_v13  ;;  %v530_v17 = vmul.f32 %v520_v14, %v520_v14  ;;  %v538_v25 = vsub.f32 %v509_v60, %v520_v14 }
 0x378   :  { %v526_v15 = vpop.xlane.xlu1 %525 }
 0x379   :  { %v528_v18 = vmul.f32 0.0078125, %v526_v15 }
 0x37b   :  { %v532_v19 = vsub.f32 %v528_v18, %v530_v17 }
 0x37d   :  { %v534_v20 = vadd.f32 1e-05, %v532_v19  ;;  %v873_v19 = vld [vmem:[%s1328_s10] ss:$0 sm:$0xff] }
 0x37f   :  { %1014 = vrsqrt.f32 %v534_v20 }
 0x384   :  { %v1013_v21 = vpop.eup %1012 }
 0x385   :  { %v539_v23 = vmul.f32 %v1013_v21, %v537_v22 }
 0x387   :  { %v545_v27 = vmul.f32 %v860_v24, %v539_v23 }
 0x389   :  { %v551_v33 = vadd.f32 %v861_v30, %v545_v27 }
 0x38b   :  { %v553_v35 = vmax.f32 %v551_v33, 0.0 }
 0x38c   :  { %v1015_v29 = vpop.eup %1014 }
 0x38d   :  { %v540_v31 = vmul.f32 %v1015_v29, %v538_v25 }
 0x38f   :  { %v546_v32 = vmul.f32 %v860_v24, %v540_v31 }
 0x391   :  { %v552_v34 = vadd.f32 %v861_v30, %v546_v32 }
 0x393   :  { %v554_v36 = vmax.f32 %v552_v34, 0.0 }
 0x395   :  { %v555_v37 = vpack.c.bf16 %v554_v36, %v553_v35 }
 0x397   :  { %941 = vmatmul.mubr.bf16.vlgmr.msra.gmra.mxu1 %v555_v37 }
 0x457   :  { %v659_v39 = vpop.f32.mrf.mxu1 }
 0x458   :  { %v660_v40 = vadd.f32 %v862_v38, %v659_v39 }
 0x459   :  { %v942_v41 = vpop.f32.mrf.mxu1 }
 0x45a   :  { %v668_v42 = vsel %vm198_vm1, %v660_v40, 0.0  ;;  %v677_v50 = vmul.f32 %v660_v40, %v660_v40 }
 0x45b   :  { %669 = vadd.xlane.f32.xlu1 %v668_v42  ;;  %v662_v43 = vpop.f32.mrf.mxu1 }
 0x45c   :  { %v663_v44 = vadd.f32 %v862_v38, %v662_v43  ;;  %v679_v51 = vsel %vm198_vm1, %v677_v50, 0.0 }
 0x45d   :  { %v943_v45 = vpop.f32.mrf.mxu1 }
 0x45e   :  { %v671_v46 = vsel %vm198_vm1, %v663_v44, 0.0  ;;  %v678_v49 = vmul.f32 %v663_v44, %v663_v44 }
 0x45f   :  { %672 = vadd.xlane.f32.xlu1 %v671_v46 }
 0x460   :  { %v682_v26 = vsel %vm198_vm1, %v678_v49, 0.0 }
 0x461   :  { %683 = vadd.xlane.f32.xlu0 %v682_v26 }
 0x463   :  { %680 = vadd.xlane.f32.xlu1 %v679_v51 }
 0x4e4   :  { %v670_v53 = vpop.xlane.xlu1 %669 }
 0x4e5   :  { %v675_v55 = vmul.f32 0.015625, %v670_v53 }
 0x4e7   :  { %v687_v61 = vmul.f32 %v675_v55, %v675_v55  ;;  %v695_v5 = vsub.f32 %v660_v40, %v675_v55 }
 0x4e8   :  { %v673_v54 = vpop.xlane.xlu1 %672 }
 0x4e9   :  { %v676_v56 = vmul.f32 0.015625, %v673_v54 }
 0x4ea   :  { %v684_v57 = vpop.xlane.xlu0 %683 }
 0x4eb   :  { %v688_v58 = vmul.f32 %v676_v56, %v676_v56  ;;  %v686_v59 = vmul.f32 0.015625, %v684_v57  ;;  %v696_v3 = vsub.f32 %v663_v44, %v676_v56 }
 0x4ec   :  { %v681_v60 = vpop.xlane.xlu1 %680 }
 0x4ed   :  { %v690_v62 = vsub.f32 %v686_v59, %v688_v58  ;;  %v685_v63 = vmul.f32 0.015625, %v681_v60 }
 0x4ef   :  { %v692_v0 = vadd.f32 1e-05, %v690_v62  ;;  %v689_v1 = vsub.f32 %v685_v63, %v687_v61 }
 0x4f1   :  { %1016 = vrsqrt.f32 %v692_v0  ;;  %v691_v2 = vadd.f32 1e-05, %v689_v1 }
 0x4f3   :  { %1018 = vrsqrt.f32 %v691_v2 }
 0x4fe   :  { %v1017_v4 = vpop.eup %1016 }
 0x4ff   :  { %v698_v6 = vmul.f32 %v1017_v4, %v696_v3 }
 0x500   :  { %v1019_v7 = vpop.eup %1018 }
 0x501   :  { %v697_v9 = vmul.f32 %v1019_v7, %v695_v5  ;;  %v704_v10 = vmul.f32 %v871_v16, %v698_v6 }
 0x503   :  { %v703_v11 = vmul.f32 %v871_v16, %v697_v9  ;;  %v710_v12 = vadd.f32 %v872_v8, %v704_v10 }
 0x505   :  { %v709_v13 = vadd.f32 %v872_v8, %v703_v11  ;;  %v712_v15 = vmax.f32 %v710_v12, 0.0 }
 0x507   :  { %v711_v14 = vmax.f32 %v709_v13, 0.0 }
 0x509   :  { %v713_v17 = vpack.c.bf16 %v712_v15, %v711_v14 }
 0x50b   :  { %953 = vmatmul.mubr.msk.bf16.vlgmr.msra.gmra.mxu0 %vm198_vm1, %v713_v17 }
 0x5cb   :  { %v790_v18 = vpop.f32.mrf.mxu0 }
 0x5cc   :  { %v791_v22 = vadd.f32 %v873_v19, %v790_v18 }
 0x5cd   :  { %v954_v20 = vpop.f32.mrf.mxu0 }
 0x5cf   :  { %v793_v21 = vpop.f32.mrf.mxu0 }
 0x5d0   :  { %v794_v23 = vadd.f32 %v873_v19, %v793_v21 }
 0x5d1   :  { %v955_v24 = vpop.f32.mrf.mxu0 }
 0x5d2   :  { %v886_v25 = vpack.c.bf16 %v794_v23, %v791_v22 }
 0x5d4   :  { %887 = vst [vmem:[#allocation7] sm:$0xff] %v886_v25  }
 0x5d5   :  { %1071 = shalt.err (!%p1068_p0)
}
 0x5d6   :  { %818 = dma.vmem_to_hbm [thread:$0]  %s813_s22, 128, %s1329_s11, [#allocation4], %s1087_s20, %s1087_s20, %s1088_s21  }
 0x5d7   :  { %1084 = dma.done.wait [#allocation4], 128  }
 0x5d8   :  { %1085 = vsyncadd [#allocation4], 4294967168 }
 0x5d9   :  { %822 = vsyncpa [#allocation3], 1 }
 0x5da   :  { %823 = vsyncpa [#allocation6], 1 }
 0x5db   :  { %824 = vsyncpa [#allocation4], 1 }

</bundles_post_ra>
